<compile_context>
chip_gen: v5e
topology: v5e:2x2
jax: 0.10.0
libtpu: 0.0.40
codegen_flags: <defaults>
</compile_context>

<pallas_src>
import jax
import jax.numpy as jnp
from jax.experimental import pallas as pl
from jax.experimental.pallas import tpu as pltpu


# ----------------------------- kernel ---------------------------------------
def dueling_kernel(x_ref, w_ref, b_ref, o_ref):
    # Single fused matmul: (TB, in_feats) @ (in_feats, n_out), f32 MXU accumulation,
    # f32 bias add, cast on store.  The dueling mean/value math is folded into W_eff.
    acc = jnp.dot(x_ref[...], w_ref[...], preferred_element_type=jnp.float32)
    o_ref[...] = (acc + b_ref[...]).astype(o_ref.dtype)


# ------------------------ parameter preparation ------------------------------
def prepare_dueling_params(w_adv, b_adv, w_v, b_v, *, compute_dtype=None, pad_lanes=None):
    """Fold both heads + the dueling mean into ONE weight/bias (done once at init).

    w_adv: (in_feats, n_actions)   nn.Linear weight, pre-transposed
    b_adv: (n_actions,)
    w_v:   (in_feats, 1)
    b_v:   (1,)

    out[:, a] = x @ (W_adv[:, a] + w_v - mean_cols(W_adv)) + (b_adv[a] + b_v - mean(b_adv))
    """
    in_feats, n_actions = w_adv.shape
    w_eff = (w_adv + w_v - w_adv.mean(axis=1, keepdims=True)).astype(jnp.float32)
    b_eff = (b_adv + b_v - b_adv.mean()).astype(jnp.float32)

    if pad_lanes is None:
        # Lane-dense output only pays off when x bytes dominate the padded output bytes.
        pad_lanes = in_feats >= 256
    n_out = n_actions
    if pad_lanes:
        n_out = pl.cdiv(n_actions, 128) * 128
        if n_out != n_actions:
            w_eff = jnp.pad(w_eff, ((0, 0), (0, n_out - n_actions)))
            b_eff = jnp.pad(b_eff, (0, n_out - n_actions))

    if compute_dtype is not None:
        w_eff = w_eff.astype(compute_dtype)
    b_eff = b_eff.reshape(1, n_out)  # bias kept f32: added after f32 accumulation
    return {"w": w_eff, "b": b_eff, "n_actions": n_actions}


# ------------------------------ forward --------------------------------------
_VMEM_CAP = 48 << 20  # stay well under v7x's 64 MiB/TC (v5e/v6e have 128 MiB physical)


def _vmem_budget(tile_b, in_feats, n_out, x_isz, w_isz, o_isz):
    # BlockSpec auto-pipelining double-buffers every operand.
    return 2 * (tile_b * in_feats * x_isz
                + tile_b * n_out * o_isz
                + in_feats * n_out * w_isz
                + n_out * 4)


def dueling_forward(x, params, *, tile_b=None, compute_dtype=None):
    """x: (B, in_feats).  Returns (B, n_actions) in x's original dtype."""
    B, in_feats = x.shape
    w_eff, b_eff, n_actions = params["w"], params["b"], params["n_actions"]
    n_out = w_eff.shape[1]
    out_dtype = x.dtype

    if compute_dtype is not None:
        x = x.astype(compute_dtype)
        if w_eff.dtype != compute_dtype:
            w_eff = w_eff.astype(compute_dtype)

    x_isz = jnp.dtype(x.dtype).itemsize
    w_isz = jnp.dtype(w_eff.dtype).itemsize
    o_isz = jnp.dtype(out_dtype).itemsize
    sublane = 16 if x_isz == 2 else 8  # keep bf16 tiles on the (16,128) packed layout

    if tile_b is None:
        if B <= sublane:
            tile_b = B
        else:
            # ~2 MiB of x per grid step (measured: >=85% HBM roofline at 1-4 MiB tiles
            # vs 30-60% at 128-256 KiB), but keep >= ~8 grid steps when B allows, for
            # software pipelining and v7x megacore sharding of the batch axis.
            tile_b = max(sublane, (2 << 20) // max(1, in_feats * x_isz))
            tile_b = min(tile_b, max(sublane, pl.cdiv(B, 8)), B)
            tile_b = max(sublane, tile_b - tile_b % sublane)
    # Shrink until the double-buffered working set fits the v7x-safe VMEM cap.
    while tile_b > sublane and _vmem_budget(tile_b, in_feats, n_out,
                                            x_isz, w_isz, o_isz) > _VMEM_CAP:
        half = tile_b // 2
        tile_b = max(sublane, half - half % sublane)

    grid = (pl.cdiv(B, tile_b),)  # ragged B ok: rows are independent, Pallas clips writeback
    vmem_limit = int(min(_VMEM_CAP,
                         max(2 * _vmem_budget(tile_b, in_feats, n_out,
                                              x_isz, w_isz, o_isz),
                             8 << 20)))

    cost = pl.CostEstimate(
        flops=2 * B * in_feats * n_out,
        transcendentals=0,
        bytes_accessed=(x_isz * B * in_feats + w_isz * in_feats * n_out
                        + 4 * n_out + o_isz * B * n_out),
    )

    out = pl.pallas_call(
        dueling_kernel,
        out_shape=jax.ShapeDtypeStruct((B, n_out), out_dtype),
        grid_spec=pltpu.PrefetchScalarGridSpec(
            num_scalar_prefetch=0,
            grid=grid,
            in_specs=[
                pl.BlockSpec((tile_b, in_feats), lambda i: (i, 0)),  # x tile (streamed)
                pl.BlockSpec((in_feats, n_out), lambda i: (0, 0)),   # W_eff (resident)
                pl.BlockSpec((1, n_out), lambda i: (0, 0)),          # b_eff (resident, f32)
            ],
            out_specs=pl.BlockSpec((tile_b, n_out), lambda i: (i, 0)),
        ),
        # TODO(synk): if plain "parallel" doesn't shard the batch grid across v7x's two
        # TensorCores, switch to pltpu.CORE_PARALLEL / an explicit core_map leading axis.
        compiler_params=pltpu.CompilerParams(
            dimension_semantics=("parallel",),
            vmem_limit_bytes=vmem_limit,
        ),
        cost_estimate=cost,
    )(x, w_eff, b_eff)

    if n_out != n_actions:
        # Lane-padded layout; a consumer that accepts the padded layout should skip this.
        out = out[:, :n_actions]
    return out


# ------------------------------- demo ----------------------------------------
if __name__ == "__main__":
    key = jax.random.PRNGKey(0)
    B, in_feats, n_actions = 16, 32, 8

    kx, kwa, kba, kwv, kbv = jax.random.split(key, 5)
    x = jax.random.normal(kx, (B, in_feats), dtype=jnp.float32)

    # Deterministic synthetic params (nn.Linear-like init, stored transposed).
    bound = 1.0 / (in_feats ** 0.5)
    w_adv = jax.random.uniform(kwa, (in_feats, n_actions), minval=-bound, maxval=bound,
                               dtype=jnp.float32)
    b_adv = jax.random.uniform(kba, (n_actions,), minval=-bound, maxval=bound,
                               dtype=jnp.float32)
    w_v = jax.random.uniform(kwv, (in_feats, 1), minval=-bound, maxval=bound,
                             dtype=jnp.float32)
    b_v = jax.random.uniform(kbv, (1,), minval=-bound, maxval=bound, dtype=jnp.float32)

    # Pure-JAX reference (matches the PyTorch forward exactly).
    advs_ref = x @ w_adv + b_adv
    vals_ref = x @ w_v + b_v
    ref = vals_ref + (advs_ref - advs_ref.mean(-1, keepdims=True))

    # 1) f32, auto layout (no lane padding at this small in_feats).
    p_f32 = prepare_dueling_params(w_adv, b_adv, w_v, b_v)
    out_f32 = jax.block_until_ready(dueling_forward(x, p_f32))
    assert out_f32.shape == (B, n_actions) and out_f32.dtype == x.dtype
    assert jnp.allclose(out_f32, ref, atol=1e-4, rtol=1e-4)  # fold = fp reassociation only

    # 2) f32, forced lane-dense (padded-to-128) output path.
    p_pad = prepare_dueling_params(w_adv, b_adv, w_v, b_v, pad_lanes=True)
    out_pad = jax.block_until_ready(dueling_forward(x, p_pad))
    assert out_pad.shape == (B, n_actions)
    assert jnp.allclose(out_pad, ref, atol=1e-4, rtol=1e-4)

    # 3) bf16 streaming (opt-in): halved HBM bytes, f32 accumulation + bias + epilogue.
    p_bf16 = prepare_dueling_params(w_adv, b_adv, w_v, b_v, compute_dtype=jnp.bfloat16)
    out_bf16 = jax.block_until_ready(
        dueling_forward(x, p_bf16, compute_dtype=jnp.bfloat16))
    assert out_bf16.shape == (B, n_actions) and out_bf16.dtype == x.dtype
    assert jnp.allclose(out_bf16, ref, atol=5e-2, rtol=5e-2)

    print("KERNEL_OK")
</pallas_src>

<mosaic_0001>
module attributes {stable_mosaic.version = 11 : i64} {
  func.func @dueling_kernel(%arg0: i32, %arg1: memref<8x32xf32, #tpu.memory_space<vmem>>, %arg2: memref<32x8xf32, #tpu.memory_space<vmem>>, %arg3: memref<1x8xf32, #tpu.memory_space<vmem>>, %arg4: memref<8x8xf32, #tpu.memory_space<vmem>>) attributes {dimension_semantics = [#tpu.dimension_semantics<parallel>], iteration_bounds = array<i64: 2>, scalar_prefetch = 0 : i64, scratch_operands = 0 : i64, tpu.core_type = #tpu.core_type<tc>, window_params = [{transform_indices = @transform_0, window_bounds = array<i64: 8, 32>}, {pipeline_mode = #tpu.pipeline_mode<synchronous>, transform_indices = @transform_1, window_bounds = array<i64: 32, 8>}, {pipeline_mode = #tpu.pipeline_mode<synchronous>, transform_indices = @transform_2, window_bounds = array<i64: 1, 8>}, {transform_indices = @transform_3, window_bounds = array<i64: 8, 8>}]} {
    %c0 = arith.constant 0 : index
    %c0_0 = arith.constant 0 : index
    %0 = vector.load %arg1[%c0, %c0_0] : memref<8x32xf32, #tpu.memory_space<vmem>>, vector<8x32xf32>
    %c0_1 = arith.constant 0 : index
    %c0_2 = arith.constant 0 : index
    %1 = vector.load %arg2[%c0_1, %c0_2] : memref<32x8xf32, #tpu.memory_space<vmem>>, vector<32x8xf32>
    %cst = arith.constant dense<0.000000e+00> : vector<8x8xf32>
    %2 = tpu.matmul %0, %1, %cst {dimension_numbers = #tpu.dot_dimension_numbers<[1], [0], [0], [1], [0, 0, 1, 1], [], []>} : vector<8x32xf32>, vector<32x8xf32>, vector<8x8xf32> -> vector<8x8xf32>
    %c0_3 = arith.constant 0 : index
    %c0_4 = arith.constant 0 : index
    %3 = vector.load %arg3[%c0_3, %c0_4] : memref<1x8xf32, #tpu.memory_space<vmem>>, vector<1x8xf32>
    %4 = vector.broadcast %3 : vector<1x8xf32> to vector<8x8xf32>
    %5 = arith.addf %2, %4 : vector<8x8xf32>
    %c0_5 = arith.constant 0 : index
    %c0_6 = arith.constant 0 : index
    %6 = vector.load %arg4[%c0_5, %c0_6] : memref<8x8xf32, #tpu.memory_space<vmem>>, vector<8x8xf32>
    tpu.vector_store %arg4[%c0_5, %c0_6], %5 {strides = array<i32>} : memref<8x8xf32, #tpu.memory_space<vmem>>, vector<8x8xf32>,
    return
  }
  func.func @transform_0(%arg0: i32) -> (i32, i32) {
    %c0_i32 = arith.constant 0 : i32
    %c0_i32_0 = arith.constant 0 : i32
    return %arg0, %c0_i32 : i32, i32
  }
  func.func @transform_1(%arg0: i32) -> (i32, i32) {
    %c0_i32 = arith.constant 0 : i32
    %c0_i32_0 = arith.constant 0 : i32
    %c0_i32_1 = arith.constant 0 : i32
    return %c0_i32, %c0_i32_0 : i32, i32
  }
  func.func @transform_2(%arg0: i32) -> (i32, i32) {
    %c0_i32 = arith.constant 0 : i32
    %c0_i32_0 = arith.constant 0 : i32
    %c0_i32_1 = arith.constant 0 : i32
    return %c0_i32, %c0_i32_0 : i32, i32
  }
  func.func @transform_3(%arg0: i32) -> (i32, i32) {
    %c0_i32 = arith.constant 0 : i32
    %c0_i32_0 = arith.constant 0 : i32
    return %arg0, %c0_i32 : i32, i32
  }
}

</mosaic_0001>

<bundles_post_ra>
// kernel: tpu_custom_call.1
= control target key start
LH: loop header
LB: loop body
LE: loop exit
PB: predicated region body
PF: predicated region fallthrough
CT: control target
= control target key end

     0   :  { %s301_s12 = smov 0   ;;  %s333_s0 = inlined_call_operand.vmem [shape: f32[16,32], index: 0, kind: input, shape index: {}]   ;;  %s334_s1 = inlined_call_operand.vmem [shape: f32[32,8], index: 1, kind: input, shape index: {}]   ;;  %s335_s2 = inlined_call_operand.vmem [shape: f32[1,8], index: 2, kind: input, shape index: {}]   ;;  %s336_s3 = inlined_call_operand.vmem [shape: f32[16,8], index: 3, kind: output, shape index: {}]  }
   0x1 LB: > { %s254_s13 = sadd.s32 4294967295, %s279_s12   ;;  %p258_p0 = scmp.ge.s32.totalorder %s279_s12, 1  ;;  %s279_s12 = sphi %s301_s12, %s13_s12  }
   0x2   : > { %p136_p1 = scmp.lt.s32.totalorder %s279_s12, 3 }
   0x4   : > { %p137_p2 = pnand %p258_p0, %p136_p1 }
   0x5   : > { %p158_p3 = scmp.lt.s32.totalorder (!%p137_p2), %s254_s13, 1 }
   0x6   : > { %140 = sbr.rel (%p137_p2) target bundleno = 148 (0x94), region = 32 }
   0xb   : > { %v170_v0 = vld [vmem:[%s334_s1 + $0x18] sm:$0xff]  ;;  %v169_v1 = vld [vmem:[%s334_s1 + $0x10] sm:$0xff]  ;;  %v168_v2 = vld [vmem:[%s334_s1 + $0x8] sm:$0xff]  ;;  %s338_s13 = smov (!%p158_p3, %s254_s13), 1  ;;  %vm175_vm0 = vcmask 261120   ;;  %vm199_vm1 = vcmask 64512  }
   0xc   : > { %191 = vmatpush.msra.mxu0 %v170_v0  ;;  %v167_v3 = vld [vmem:[%s334_s1] sm:$0xff]  ;;  %s259_s22 = sshll.u32 %s338_s13, 3 }
   0xd   : > { %s161_s25 = scalar_lea.vmem %s333_s0, %s259_s22  ;;  %v272_v5 = vld [vmem:[%s335_s2] ss:$0 sm:$0xff]  ;;  %s165_s30 = scalar_lea.vmem %s336_s3, %s259_s22 }
   0xe   : > { %192 = vmatpush.msra.mxu0 %v169_v1  ;;  %v166_v4 = vld [vmem:[%s161_s25] sm:$0xff] }
  0x10   : > { %193 = vmatpush.msra.mxu0 %v168_v2 }
  0x12   : > { %194 = vmatpush.msra.mxu0 %v167_v3 }
  0x13   : > { %261 = vmatmul.msk.f32.vlgmr.msra.gmra.mxu0 %vm175_vm0, %v166_v4 }
  0x90   : > { %v196_v6 = vpop.f32.mrf.mxu0 }
  0x91   : > { %v197_v7 = vadd.f32 %v272_v5, %v196_v6 }
  0x93   : > { %200 = vst.msk [vmem:[%s165_s30] sm:$0xff] %vm199_vm1, %v197_v7 }
  0x94 PF: > { %s13_s12 = sadd.s32 1, %s279_s12  }
  0x95   : > { %p10_p4 = scmp.ge.s32.totalorder %s13_s12, 4  }
  0x97   :  { %12 = sbr.rel (!%p10_p4) target bundleno = 1 (0x1), region = 62 }

</bundles_post_ra>
